<compile_context>
chip_gen: v7x
topology: tpu7x:2x2x1
jax: 0.10.0
libtpu: 0.0.40
codegen_flags: <defaults>
</compile_context>

<pallas_src>
import functools

import jax
import jax.numpy as jnp
from jax import lax
from jax.experimental import pallas as pl
from jax.experimental.pallas import tpu as pltpu


def _make_sqnet_kernel(hidden, rows_per_block, chunk_rows=8):
    """Builds the kernel for a given hidden size and per-block sublane count."""
    H = hidden
    # Offsets into the packed parameter vector (length 7H + 7).
    W1, B1 = 0, 3 * H
    W2, B2 = 4 * H, 7 * H
    W34, B34 = 7 * H + 3, 7 * H + 6

    n_chunks = rows_per_block // chunk_rows
    unroll = True if n_chunks <= 32 else 8
    n_acc = min(4, H)          # partial accumulators for the fc2 reduction

    def kernel(p_ref, x_ref, o_ref):
        # p_ref: (7H+7,) f32 in SMEM.  x_ref: (3, rows_per_block, 128) VMEM.
        # o_ref: (1, rows_per_block, 128) VMEM.
        #
        # Hoist every parameter scalar load out of the chunk loop; the vector
        # ops below consume them as scalar-splat operands.
        w1 = [[p_ref[W1 + 3 * j + k] for k in range(3)] for j in range(H)]
        b1 = [p_ref[B1 + j] for j in range(H)]
        w2 = [[p_ref[W2 + H * j + k] for k in range(H)] for j in range(3)]
        b2 = [p_ref[B2 + j] for j in range(3)]
        w34 = [p_ref[W34 + k] for k in range(3)]
        b34 = p_ref[B34]

        def body(c, carry):
            r0 = pl.multiple_of(c * chunk_rows, chunk_rows)
            rows = pl.ds(r0, chunk_rows)
            # 3 register-resident (8, 128) input slabs.
            xs = [x_ref[f, rows, :] for f in range(3)]

            # fc1: 3 -> H, scalar-splat FMAs (bias folded into the first one),
            # tanh on the EUP.
            h1 = []
            for j in range(H):
                acc = w1[j][0] * xs[0] + b1[j]
                acc = acc + w1[j][1] * xs[1]
                acc = acc + w1[j][2] * xs[2]
                h1.append(jnp.tanh(acc))

            # fc2: H -> 3, split the H-deep reduction over n_acc independent
            # accumulator chains so the 4 VALU slots stay fed.
            h2 = []
            for j in range(3):
                accs = [None] * n_acc
                for k in range(H):
                    t = w2[j][k] * h1[k]
                    s = k % n_acc
                    accs[s] = t if accs[s] is None else accs[s] + t
                tot = accs[0] + b2[j]
                for s in range(1, n_acc):
                    tot = tot + accs[s]
                h2.append(jnp.tanh(tot))

            # fc3 composed with fc4, folded in the wrapper to one 3 -> 1 affine.
            o = w34[0] * h2[0] + b34
            o = o + w34[1] * h2[1]
            o = o + w34[2] * h2[2]
            o_ref[0, rows, :] = o            # dense (8,128) store, no mask
            return carry

        lax.fori_loop(0, n_chunks, body, 0, unroll=unroll)

    return kernel


@functools.partial(jax.jit, static_argnames=("block_n",))
def sqnet_forward(x, params, *, block_n=32768):
    """x: (N, 3) float32 -> (N, 1) float32.

    params: PyTorch-style (out, in) weights and (out, 1) biases for
    fc1, fc2, fc3, fc4.
    """
    w1, b1, w2, b2, w3, b3, w4, b4 = params
    n, din = x.shape
    assert din == 3
    H = w1.shape[0]

    # Fold fc3 + fc4 (no nonlinearity between them) into one 3 -> 1 affine.
    w34 = w4 @ w3            # (1, 3)
    b34 = w4 @ b3 + b4       # (1, 1)

    # Pack every weight/bias into one small vector -> single SMEM operand.
    p_flat = jnp.concatenate([
        w1.reshape(-1), b1.reshape(-1),
        w2.reshape(-1), b2.reshape(-1),
        w34.reshape(-1), b34.reshape(-1),
    ]).astype(jnp.float32)
    assert p_flat.shape[0] == 7 * H + 7

    # Tile sizing: bn must be a multiple of 1024 (= 8 sublanes x 128 lanes per
    # register-resident chunk).  Cap bn so the grid keeps >= 2 parallel steps
    # when the batch allows it (v7x has 2 TensorCores; neutral elsewhere).
    MIN_BN = 1024
    n_min = pl.cdiv(n, MIN_BN) * MIN_BN
    bn = min(int(block_n), n_min)
    if n_min >= 2 * MIN_BN:
        bn = min(bn, max(MIN_BN, (n_min // 2) // MIN_BN * MIN_BN))
    bn = max(MIN_BN, (bn // MIN_BN) * MIN_BN)
    n_pad = pl.cdiv(n, bn) * bn

    rows = n_pad // 128          # total sublanes
    rows_blk = bn // 128         # sublanes per grid step (multiple of 8)

    # Batch-on-(sublanes, lanes) layout: (3, n_pad//128, 128) dense slabs.
    # pad + transpose + reshape fuse into one relayout copy in XLA.
    xT = jnp.pad(x, ((0, n_pad - n), (0, 0))).T.reshape(3, rows, 128)

    kernel = _make_sqnet_kernel(H, rows_blk)

    out = pl.pallas_call(
        kernel,
        out_shape=jax.ShapeDtypeStruct((1, rows, 128), jnp.float32),
        grid_spec=pltpu.PrefetchScalarGridSpec(
            num_scalar_prefetch=0,
            grid=(n_pad // bn,),
            in_specs=[
                # Packed params: whole (tiny) array in SMEM, read as scalars.
                pl.BlockSpec(memory_space=pltpu.MemorySpace.SMEM),
                # x: (3, rows_blk, 128) dense slabs per grid step.
                pl.BlockSpec((3, rows_blk, 128), lambda i: (0, i, 0)),
            ],
            out_specs=pl.BlockSpec((1, rows_blk, 128), lambda i: (0, i, 0)),
        ),
        compiler_params=pltpu.CompilerParams(
            dimension_semantics=("parallel",)),
    )(p_flat, xT)

    # (1, n_pad//128, 128) -> (n, 1); element (0, r, l) is batch row r*128+l,
    # so a plain row-major reshape restores order; padded rows are sliced off.
    return out.reshape(n_pad, 1)[:n]


def init_sqnet_params(key, hidden_units=16):
    """Xavier-normal weights (as in the PyTorch module) and PyTorch-Linear
    uniform biases. Weights stored PyTorch-style as (out, in); biases (out, 1)."""
    def xavier_normal(k, fan_out, fan_in):
        std = (2.0 / (fan_in + fan_out)) ** 0.5
        return std * jax.random.normal(k, (fan_out, fan_in), jnp.float32)

    def bias_uniform(k, fan_out, fan_in):
        bound = 1.0 / (fan_in ** 0.5)
        return jax.random.uniform(k, (fan_out, 1), jnp.float32, -bound, bound)

    ks = jax.random.split(key, 8)
    dims = [(hidden_units, 3), (3, hidden_units), (3, 3), (1, 3)]  # (out, in)
    params = []
    for i, (fo, fi) in enumerate(dims):
        params.append(xavier_normal(ks[2 * i], fo, fi))
        params.append(bias_uniform(ks[2 * i + 1], fo, fi))
    return tuple(params)


def sqnet_reference(x, params):
    """Pure-JAX reference matching the PyTorch forward (unfused fc3/fc4)."""
    w1, b1, w2, b2, w3, b3, w4, b4 = params
    h = jnp.tanh(x @ w1.T + b1.T)
    h = jnp.tanh(h @ w2.T + b2.T)
    h = h @ w3.T + b3.T
    return h @ w4.T + b4.T


if __name__ == "__main__":
    key = jax.random.PRNGKey(0)
    k_param, k_x = jax.random.split(key)

    hidden_units = 16
    params = init_sqnet_params(k_param, hidden_units)

    # Deliberately ragged batch of 3-D inputs: exercises pad + slice and a
    # multi-step "parallel" grid.
    n = 4321
    x = jax.random.normal(k_x, (n, 3), jnp.float32)
    ref = sqnet_reference(x, params)

    # Small explicit tile: 5 grid steps, one register-resident chunk each.
    out_small = jax.block_until_ready(sqnet_forward(x, params, block_n=1024))
    assert out_small.shape == (n, 1), out_small.shape
    err_small = float(jnp.max(jnp.abs(out_small - ref)))
    assert jnp.allclose(out_small, ref, atol=1e-5, rtol=1e-5), err_small

    # Default (large) tile path: bn gets clamped to keep >= 2 grid steps.
    out_big = jax.block_until_ready(sqnet_forward(x, params))
    err_big = float(jnp.max(jnp.abs(out_big - ref)))
    assert jnp.allclose(out_big, ref, atol=1e-5, rtol=1e-5), err_big

    print("KERNEL_OK")
</pallas_src>

<mosaic_0001>
module attributes {stable_mosaic.version = 11 : i64} {
  func.func @kernel(%arg0: i32, %arg1: memref<119xf32, #tpu.memory_space<smem>>, %arg2: memref<3x8x128xf32, #tpu.memory_space<vmem>>, %arg3: memref<1x8x128xf32, #tpu.memory_space<vmem>>) attributes {dimension_semantics = [#tpu.dimension_semantics<parallel>], iteration_bounds = array<i64: 5>, scalar_prefetch = 0 : i64, scratch_operands = 0 : i64, tpu.core_type = #tpu.core_type<tc>, window_params = [{transform_indices = @transform_0, window_bounds = array<i64: 119>}, {transform_indices = @transform_1, window_bounds = array<i64: 3, 8, 128>}, {transform_indices = @transform_2, window_bounds = array<i64: 1, 8, 128>}]} {
    %c0 = arith.constant 0 : index
    %0 = memref.load %arg1[%c0] : memref<119xf32, #tpu.memory_space<smem>>
    %c1 = arith.constant 1 : index
    %1 = memref.load %arg1[%c1] : memref<119xf32, #tpu.memory_space<smem>>
    %c2 = arith.constant 2 : index
    %2 = memref.load %arg1[%c2] : memref<119xf32, #tpu.memory_space<smem>>
    %c3 = arith.constant 3 : index
    %3 = memref.load %arg1[%c3] : memref<119xf32, #tpu.memory_space<smem>>
    %c4 = arith.constant 4 : index
    %4 = memref.load %arg1[%c4] : memref<119xf32, #tpu.memory_space<smem>>
    %c5 = arith.constant 5 : index
    %5 = memref.load %arg1[%c5] : memref<119xf32, #tpu.memory_space<smem>>
    %c6 = arith.constant 6 : index
    %6 = memref.load %arg1[%c6] : memref<119xf32, #tpu.memory_space<smem>>
    %c7 = arith.constant 7 : index
    %7 = memref.load %arg1[%c7] : memref<119xf32, #tpu.memory_space<smem>>
    %c8 = arith.constant 8 : index
    %8 = memref.load %arg1[%c8] : memref<119xf32, #tpu.memory_space<smem>>
    %c9 = arith.constant 9 : index
    %9 = memref.load %arg1[%c9] : memref<119xf32, #tpu.memory_space<smem>>
    %c10 = arith.constant 10 : index
    %10 = memref.load %arg1[%c10] : memref<119xf32, #tpu.memory_space<smem>>
    %c11 = arith.constant 11 : index
    %11 = memref.load %arg1[%c11] : memref<119xf32, #tpu.memory_space<smem>>
    %c12 = arith.constant 12 : index
    %12 = memref.load %arg1[%c12] : memref<119xf32, #tpu.memory_space<smem>>
    %c13 = arith.constant 13 : index
    %13 = memref.load %arg1[%c13] : memref<119xf32, #tpu.memory_space<smem>>
    %c14 = arith.constant 14 : index
    %14 = memref.load %arg1[%c14] : memref<119xf32, #tpu.memory_space<smem>>
    %c15 = arith.constant 15 : index
    %15 = memref.load %arg1[%c15] : memref<119xf32, #tpu.memory_space<smem>>
    %c16 = arith.constant 16 : index
    %16 = memref.load %arg1[%c16] : memref<119xf32, #tpu.memory_space<smem>>
    %c17 = arith.constant 17 : index
    %17 = memref.load %arg1[%c17] : memref<119xf32, #tpu.memory_space<smem>>
    %c18 = arith.constant 18 : index
    %18 = memref.load %arg1[%c18] : memref<119xf32, #tpu.memory_space<smem>>
    %c19 = arith.constant 19 : index
    %19 = memref.load %arg1[%c19] : memref<119xf32, #tpu.memory_space<smem>>
    %c20 = arith.constant 20 : index
    %20 = memref.load %arg1[%c20] : memref<119xf32, #tpu.memory_space<smem>>
    %c21 = arith.constant 21 : index
    %21 = memref.load %arg1[%c21] : memref<119xf32, #tpu.memory_space<smem>>
    %c22 = arith.constant 22 : index
    %22 = memref.load %arg1[%c22] : memref<119xf32, #tpu.memory_space<smem>>
    %c23 = arith.constant 23 : index
    %23 = memref.load %arg1[%c23] : memref<119xf32, #tpu.memory_space<smem>>
    %c24 = arith.constant 24 : index
    %24 = memref.load %arg1[%c24] : memref<119xf32, #tpu.memory_space<smem>>
    %c25 = arith.constant 25 : index
    %25 = memref.load %arg1[%c25] : memref<119xf32, #tpu.memory_space<smem>>
    %c26 = arith.constant 26 : index
    %26 = memref.load %arg1[%c26] : memref<119xf32, #tpu.memory_space<smem>>
    %c27 = arith.constant 27 : index
    %27 = memref.load %arg1[%c27] : memref<119xf32, #tpu.memory_space<smem>>
    %c28 = arith.constant 28 : index
    %28 = memref.load %arg1[%c28] : memref<119xf32, #tpu.memory_space<smem>>
    %c29 = arith.constant 29 : index
    %29 = memref.load %arg1[%c29] : memref<119xf32, #tpu.memory_space<smem>>
    %c30 = arith.constant 30 : index
    %30 = memref.load %arg1[%c30] : memref<119xf32, #tpu.memory_space<smem>>
    %c31 = arith.constant 31 : index
    %31 = memref.load %arg1[%c31] : memref<119xf32, #tpu.memory_space<smem>>
    %c32 = arith.constant 32 : index
    %32 = memref.load %arg1[%c32] : memref<119xf32, #tpu.memory_space<smem>>
    %c33 = arith.constant 33 : index
    %33 = memref.load %arg1[%c33] : memref<119xf32, #tpu.memory_space<smem>>
    %c34 = arith.constant 34 : index
    %34 = memref.load %arg1[%c34] : memref<119xf32, #tpu.memory_space<smem>>
    %c35 = arith.constant 35 : index
    %35 = memref.load %arg1[%c35] : memref<119xf32, #tpu.memory_space<smem>>
    %c36 = arith.constant 36 : index
    %36 = memref.load %arg1[%c36] : memref<119xf32, #tpu.memory_space<smem>>
    %c37 = arith.constant 37 : index
    %37 = memref.load %arg1[%c37] : memref<119xf32, #tpu.memory_space<smem>>
    %c38 = arith.constant 38 : index
    %38 = memref.load %arg1[%c38] : memref<119xf32, #tpu.memory_space<smem>>
    %c39 = arith.constant 39 : index
    %39 = memref.load %arg1[%c39] : memref<119xf32, #tpu.memory_space<smem>>
    %c40 = arith.constant 40 : index
    %40 = memref.load %arg1[%c40] : memref<119xf32, #tpu.memory_space<smem>>
    %c41 = arith.constant 41 : index
    %41 = memref.load %arg1[%c41] : memref<119xf32, #tpu.memory_space<smem>>
    %c42 = arith.constant 42 : index
    %42 = memref.load %arg1[%c42] : memref<119xf32, #tpu.memory_space<smem>>
    %c43 = arith.constant 43 : index
    %43 = memref.load %arg1[%c43] : memref<119xf32, #tpu.memory_space<smem>>
    %c44 = arith.constant 44 : index
    %44 = memref.load %arg1[%c44] : memref<119xf32, #tpu.memory_space<smem>>
    %c45 = arith.constant 45 : index
    %45 = memref.load %arg1[%c45] : memref<119xf32, #tpu.memory_space<smem>>
    %c46 = arith.constant 46 : index
    %46 = memref.load %arg1[%c46] : memref<119xf32, #tpu.memory_space<smem>>
    %c47 = arith.constant 47 : index
    %47 = memref.load %arg1[%c47] : memref<119xf32, #tpu.memory_space<smem>>
    %c48 = arith.constant 48 : index
    %48 = memref.load %arg1[%c48] : memref<119xf32, #tpu.memory_space<smem>>
    %c49 = arith.constant 49 : index
    %49 = memref.load %arg1[%c49] : memref<119xf32, #tpu.memory_space<smem>>
    %c50 = arith.constant 50 : index
    %50 = memref.load %arg1[%c50] : memref<119xf32, #tpu.memory_space<smem>>
    %c51 = arith.constant 51 : index
    %51 = memref.load %arg1[%c51] : memref<119xf32, #tpu.memory_space<smem>>
    %c52 = arith.constant 52 : index
    %52 = memref.load %arg1[%c52] : memref<119xf32, #tpu.memory_space<smem>>
    %c53 = arith.constant 53 : index
    %53 = memref.load %arg1[%c53] : memref<119xf32, #tpu.memory_space<smem>>
    %c54 = arith.constant 54 : index
    %54 = memref.load %arg1[%c54] : memref<119xf32, #tpu.memory_space<smem>>
    %c55 = arith.constant 55 : index
    %55 = memref.load %arg1[%c55] : memref<119xf32, #tpu.memory_space<smem>>
    %c56 = arith.constant 56 : index
    %56 = memref.load %arg1[%c56] : memref<119xf32, #tpu.memory_space<smem>>
    %c57 = arith.constant 57 : index
    %57 = memref.load %arg1[%c57] : memref<119xf32, #tpu.memory_space<smem>>
    %c58 = arith.constant 58 : index
    %58 = memref.load %arg1[%c58] : memref<119xf32, #tpu.memory_space<smem>>
    %c59 = arith.constant 59 : index
    %59 = memref.load %arg1[%c59] : memref<119xf32, #tpu.memory_space<smem>>
    %c60 = arith.constant 60 : index
    %60 = memref.load %arg1[%c60] : memref<119xf32, #tpu.memory_space<smem>>
    %c61 = arith.constant 61 : index
    %61 = memref.load %arg1[%c61] : memref<119xf32, #tpu.memory_space<smem>>
    %c62 = arith.constant 62 : index
    %62 = memref.load %arg1[%c62] : memref<119xf32, #tpu.memory_space<smem>>
    %c63 = arith.constant 63 : index
    %63 = memref.load %arg1[%c63] : memref<119xf32, #tpu.memory_space<smem>>
    %c64 = arith.constant 64 : index
    %64 = memref.load %arg1[%c64] : memref<119xf32, #tpu.memory_space<smem>>
    %c65 = arith.constant 65 : index
    %65 = memref.load %arg1[%c65] : memref<119xf32, #tpu.memory_space<smem>>
    %c66 = arith.constant 66 : index
    %66 = memref.load %arg1[%c66] : memref<119xf32, #tpu.memory_space<smem>>
    %c67 = arith.constant 67 : index
    %67 = memref.load %arg1[%c67] : memref<119xf32, #tpu.memory_space<smem>>
    %c68 = arith.constant 68 : index
    %68 = memref.load %arg1[%c68] : memref<119xf32, #tpu.memory_space<smem>>
    %c69 = arith.constant 69 : index
    %69 = memref.load %arg1[%c69] : memref<119xf32, #tpu.memory_space<smem>>
    %c70 = arith.constant 70 : index
    %70 = memref.load %arg1[%c70] : memref<119xf32, #tpu.memory_space<smem>>
    %c71 = arith.constant 71 : index
    %71 = memref.load %arg1[%c71] : memref<119xf32, #tpu.memory_space<smem>>
    %c72 = arith.constant 72 : index
    %72 = memref.load %arg1[%c72] : memref<119xf32, #tpu.memory_space<smem>>
    %c73 = arith.constant 73 : index
    %73 = memref.load %arg1[%c73] : memref<119xf32, #tpu.memory_space<smem>>
    %c74 = arith.constant 74 : index
    %74 = memref.load %arg1[%c74] : memref<119xf32, #tpu.memory_space<smem>>
    %c75 = arith.constant 75 : index
    %75 = memref.load %arg1[%c75] : memref<119xf32, #tpu.memory_space<smem>>
    %c76 = arith.constant 76 : index
    %76 = memref.load %arg1[%c76] : memref<119xf32, #tpu.memory_space<smem>>
    %c77 = arith.constant 77 : index
    %77 = memref.load %arg1[%c77] : memref<119xf32, #tpu.memory_space<smem>>
    %c78 = arith.constant 78 : index
    %78 = memref.load %arg1[%c78] : memref<119xf32, #tpu.memory_space<smem>>
    %c79 = arith.constant 79 : index
    %79 = memref.load %arg1[%c79] : memref<119xf32, #tpu.memory_space<smem>>
    %c80 = arith.constant 80 : index
    %80 = memref.load %arg1[%c80] : memref<119xf32, #tpu.memory_space<smem>>
    %c81 = arith.constant 81 : index
    %81 = memref.load %arg1[%c81] : memref<119xf32, #tpu.memory_space<smem>>
    %c82 = arith.constant 82 : index
    %82 = memref.load %arg1[%c82] : memref<119xf32, #tpu.memory_space<smem>>
    %c83 = arith.constant 83 : index
    %83 = memref.load %arg1[%c83] : memref<119xf32, #tpu.memory_space<smem>>
    %c84 = arith.constant 84 : index
    %84 = memref.load %arg1[%c84] : memref<119xf32, #tpu.memory_space<smem>>
    %c85 = arith.constant 85 : index
    %85 = memref.load %arg1[%c85] : memref<119xf32, #tpu.memory_space<smem>>
    %c86 = arith.constant 86 : index
    %86 = memref.load %arg1[%c86] : memref<119xf32, #tpu.memory_space<smem>>
    %c87 = arith.constant 87 : index
    %87 = memref.load %arg1[%c87] : memref<119xf32, #tpu.memory_space<smem>>
    %c88 = arith.constant 88 : index
    %88 = memref.load %arg1[%c88] : memref<119xf32, #tpu.memory_space<smem>>
    %c89 = arith.constant 89 : index
    %89 = memref.load %arg1[%c89] : memref<119xf32, #tpu.memory_space<smem>>
    %c90 = arith.constant 90 : index
    %90 = memref.load %arg1[%c90] : memref<119xf32, #tpu.memory_space<smem>>
    %c91 = arith.constant 91 : index
    %91 = memref.load %arg1[%c91] : memref<119xf32, #tpu.memory_space<smem>>
    %c92 = arith.constant 92 : index
    %92 = memref.load %arg1[%c92] : memref<119xf32, #tpu.memory_space<smem>>
    %c93 = arith.constant 93 : index
    %93 = memref.load %arg1[%c93] : memref<119xf32, #tpu.memory_space<smem>>
    %c94 = arith.constant 94 : index
    %94 = memref.load %arg1[%c94] : memref<119xf32, #tpu.memory_space<smem>>
    %c95 = arith.constant 95 : index
    %95 = memref.load %arg1[%c95] : memref<119xf32, #tpu.memory_space<smem>>
    %c96 = arith.constant 96 : index
    %96 = memref.load %arg1[%c96] : memref<119xf32, #tpu.memory_space<smem>>
    %c97 = arith.constant 97 : index
    %97 = memref.load %arg1[%c97] : memref<119xf32, #tpu.memory_space<smem>>
    %c98 = arith.constant 98 : index
    %98 = memref.load %arg1[%c98] : memref<119xf32, #tpu.memory_space<smem>>
    %c99 = arith.constant 99 : index
    %99 = memref.load %arg1[%c99] : memref<119xf32, #tpu.memory_space<smem>>
    %c100 = arith.constant 100 : index
    %100 = memref.load %arg1[%c100] : memref<119xf32, #tpu.memory_space<smem>>
    %c101 = arith.constant 101 : index
    %101 = memref.load %arg1[%c101] : memref<119xf32, #tpu.memory_space<smem>>
    %c102 = arith.constant 102 : index
    %102 = memref.load %arg1[%c102] : memref<119xf32, #tpu.memory_space<smem>>
    %c103 = arith.constant 103 : index
    %103 = memref.load %arg1[%c103] : memref<119xf32, #tpu.memory_space<smem>>
    %c104 = arith.constant 104 : index
    %104 = memref.load %arg1[%c104] : memref<119xf32, #tpu.memory_space<smem>>
    %c105 = arith.constant 105 : index
    %105 = memref.load %arg1[%c105] : memref<119xf32, #tpu.memory_space<smem>>
    %c106 = arith.constant 106 : index
    %106 = memref.load %arg1[%c106] : memref<119xf32, #tpu.memory_space<smem>>
    %c107 = arith.constant 107 : index
    %107 = memref.load %arg1[%c107] : memref<119xf32, #tpu.memory_space<smem>>
    %c108 = arith.constant 108 : index
    %108 = memref.load %arg1[%c108] : memref<119xf32, #tpu.memory_space<smem>>
    %c109 = arith.constant 109 : index
    %109 = memref.load %arg1[%c109] : memref<119xf32, #tpu.memory_space<smem>>
    %c110 = arith.constant 110 : index
    %110 = memref.load %arg1[%c110] : memref<119xf32, #tpu.memory_space<smem>>
    %c111 = arith.constant 111 : index
    %111 = memref.load %arg1[%c111] : memref<119xf32, #tpu.memory_space<smem>>
    %c112 = arith.constant 112 : index
    %112 = memref.load %arg1[%c112] : memref<119xf32, #tpu.memory_space<smem>>
    %c113 = arith.constant 113 : index
    %113 = memref.load %arg1[%c113] : memref<119xf32, #tpu.memory_space<smem>>
    %c114 = arith.constant 114 : index
    %114 = memref.load %arg1[%c114] : memref<119xf32, #tpu.memory_space<smem>>
    %c115 = arith.constant 115 : index
    %115 = memref.load %arg1[%c115] : memref<119xf32, #tpu.memory_space<smem>>
    %c116 = arith.constant 116 : index
    %116 = memref.load %arg1[%c116] : memref<119xf32, #tpu.memory_space<smem>>
    %c117 = arith.constant 117 : index
    %117 = memref.load %arg1[%c117] : memref<119xf32, #tpu.memory_space<smem>>
    %c118 = arith.constant 118 : index
    %118 = memref.load %arg1[%c118] : memref<119xf32, #tpu.memory_space<smem>>
    %c0_i32 = arith.constant 0 : i32
    %c8_i32 = arith.constant 8 : i32
    %119 = arith.muli %c0_i32, %c8_i32 : i32
    %120 = tpu.assume_multiple %119, 8 : i32
    %c0_0 = arith.constant 0 : index
    %121 = arith.index_cast %120 : i32 to index
    %c0_1 = arith.constant 0 : index
    %122 = vector.load %arg2[%c0_0, %121, %c0_1] : memref<3x8x128xf32, #tpu.memory_space<vmem>>, vector<1x8x128xf32>
    %123 = vector.shape_cast %122 : vector<1x8x128xf32> to vector<8x128xf32>
    %c1_2 = arith.constant 1 : index
    %124 = arith.index_cast %120 : i32 to index
    %c0_3 = arith.constant 0 : index
    %125 = vector.load %arg2[%c1_2, %124, %c0_3] : memref<3x8x128xf32, #tpu.memory_space<vmem>>, vector<1x8x128xf32>
    %126 = vector.shape_cast %125 : vector<1x8x128xf32> to vector<8x128xf32>
    %c2_4 = arith.constant 2 : index
    %127 = arith.index_cast %120 : i32 to index
    %c0_5 = arith.constant 0 : index
    %128 = vector.load %arg2[%c2_4, %127, %c0_5] : memref<3x8x128xf32, #tpu.memory_space<vmem>>, vector<1x8x128xf32>
    %129 = vector.shape_cast %128 : vector<1x8x128xf32> to vector<8x128xf32>
    %130 = vector.broadcast %0 : f32 to vector<8x128xf32>
    %131 = arith.mulf %130, %123 : vector<8x128xf32>
    %132 = vector.broadcast %48 : f32 to vector<8x128xf32>
    %133 = arith.addf %131, %132 : vector<8x128xf32>
    %134 = vector.broadcast %1 : f32 to vector<8x128xf32>
    %135 = arith.mulf %134, %126 : vector<8x128xf32>
    %136 = arith.addf %133, %135 : vector<8x128xf32>
    %137 = vector.broadcast %2 : f32 to vector<8x128xf32>
    %138 = arith.mulf %137, %129 : vector<8x128xf32>
    %139 = arith.addf %136, %138 : vector<8x128xf32>
    %140 = math.tanh %139 : vector<8x128xf32>
    %141 = vector.broadcast %3 : f32 to vector<8x128xf32>
    %142 = arith.mulf %141, %123 : vector<8x128xf32>
    %143 = vector.broadcast %49 : f32 to vector<8x128xf32>
    %144 = arith.addf %142, %143 : vector<8x128xf32>
    %145 = vector.broadcast %4 : f32 to vector<8x128xf32>
    %146 = arith.mulf %145, %126 : vector<8x128xf32>
    %147 = arith.addf %144, %146 : vector<8x128xf32>
    %148 = vector.broadcast %5 : f32 to vector<8x128xf32>
    %149 = arith.mulf %148, %129 : vector<8x128xf32>
    %150 = arith.addf %147, %149 : vector<8x128xf32>
    %151 = math.tanh %150 : vector<8x128xf32>
    %152 = vector.broadcast %6 : f32 to vector<8x128xf32>
    %153 = arith.mulf %152, %123 : vector<8x128xf32>
    %154 = vector.broadcast %50 : f32 to vector<8x128xf32>
    %155 = arith.addf %153, %154 : vector<8x128xf32>
    %156 = vector.broadcast %7 : f32 to vector<8x128xf32>
    %157 = arith.mulf %156, %126 : vector<8x128xf32>
    %158 = arith.addf %155, %157 : vector<8x128xf32>
    %159 = vector.broadcast %8 : f32 to vector<8x128xf32>
    %160 = arith.mulf %159, %129 : vector<8x128xf32>
    %161 = arith.addf %158, %160 : vector<8x128xf32>
    %162 = math.tanh %161 : vector<8x128xf32>
    %163 = vector.broadcast %9 : f32 to vector<8x128xf32>
    %164 = arith.mulf %163, %123 : vector<8x128xf32>
    %165 = vector.broadcast %51 : f32 to vector<8x128xf32>
    %166 = arith.addf %164, %165 : vector<8x128xf32>
    %167 = vector.broadcast %10 : f32 to vector<8x128xf32>
    %168 = arith.mulf %167, %126 : vector<8x128xf32>
    %169 = arith.addf %166, %168 : vector<8x128xf32>
    %170 = vector.broadcast %11 : f32 to vector<8x128xf32>
    %171 = arith.mulf %170, %129 : vector<8x128xf32>
    %172 = arith.addf %169, %171 : vector<8x128xf32>
    %173 = math.tanh %172 : vector<8x128xf32>
    %174 = vector.broadcast %12 : f32 to vector<8x128xf32>
    %175 = arith.mulf %174, %123 : vector<8x128xf32>
    %176 = vector.broadcast %52 : f32 to vector<8x128xf32>
    %177 = arith.addf %175, %176 : vector<8x128xf32>
    %178 = vector.broadcast %13 : f32 to vector<8x128xf32>
    %179 = arith.mulf %178, %126 : vector<8x128xf32>
    %180 = arith.addf %177, %179 : vector<8x128xf32>
    %181 = vector.broadcast %14 : f32 to vector<8x128xf32>
    %182 = arith.mulf %181, %129 : vector<8x128xf32>
    %183 = arith.addf %180, %182 : vector<8x128xf32>
    %184 = math.tanh %183 : vector<8x128xf32>
    %185 = vector.broadcast %15 : f32 to vector<8x128xf32>
    %186 = arith.mulf %185, %123 : vector<8x128xf32>
    %187 = vector.broadcast %53 : f32 to vector<8x128xf32>
    %188 = arith.addf %186, %187 : vector<8x128xf32>
    %189 = vector.broadcast %16 : f32 to vector<8x128xf32>
    %190 = arith.mulf %189, %126 : vector<8x128xf32>
    %191 = arith.addf %188, %190 : vector<8x128xf32>
    %192 = vector.broadcast %17 : f32 to vector<8x128xf32>
    %193 = arith.mulf %192, %129 : vector<8x128xf32>
    %194 = arith.addf %191, %193 : vector<8x128xf32>
    %195 = math.tanh %194 : vector<8x128xf32>
    %196 = vector.broadcast %18 : f32 to vector<8x128xf32>
    %197 = arith.mulf %196, %123 : vector<8x128xf32>
    %198 = vector.broadcast %54 : f32 to vector<8x128xf32>
    %199 = arith.addf %197, %198 : vector<8x128xf32>
    %200 = vector.broadcast %19 : f32 to vector<8x128xf32>
    %201 = arith.mulf %200, %126 : vector<8x128xf32>
    %202 = arith.addf %199, %201 : vector<8x128xf32>
    %203 = vector.broadcast %20 : f32 to vector<8x128xf32>
    %204 = arith.mulf %203, %129 : vector<8x128xf32>
    %205 = arith.addf %202, %204 : vector<8x128xf32>
    %206 = math.tanh %205 : vector<8x128xf32>
    %207 = vector.broadcast %21 : f32 to vector<8x128xf32>
    %208 = arith.mulf %207, %123 : vector<8x128xf32>
    %209 = vector.broadcast %55 : f32 to vector<8x128xf32>
    %210 = arith.addf %208, %209 : vector<8x128xf32>
    %211 = vector.broadcast %22 : f32 to vector<8x128xf32>
    %212 = arith.mulf %211, %126 : vector<8x128xf32>
    %213 = arith.addf %210, %212 : vector<8x128xf32>
    %214 = vector.broadcast %23 : f32 to vector<8x128xf32>
    %215 = arith.mulf %214, %129 : vector<8x128xf32>
    %216 = arith.addf %213, %215 : vector<8x128xf32>
    %217 = math.tanh %216 : vector<8x128xf32>
    %218 = vector.broadcast %24 : f32 to vector<8x128xf32>
    %219 = arith.mulf %218, %123 : vector<8x128xf32>
    %220 = vector.broadcast %56 : f32 to vector<8x128xf32>
    %221 = arith.addf %219, %220 : vector<8x128xf32>
    %222 = vector.broadcast %25 : f32 to vector<8x128xf32>
    %223 = arith.mulf %222, %126 : vector<8x128xf32>
    %224 = arith.addf %221, %223 : vector<8x128xf32>
    %225 = vector.broadcast %26 : f32 to vector<8x128xf32>
    %226 = arith.mulf %225, %129 : vector<8x128xf32>
    %227 = arith.addf %224, %226 : vector<8x128xf32>
    %228 = math.tanh %227 : vector<8x128xf32>
    %229 = vector.broadcast %27 : f32 to vector<8x128xf32>
    %230 = arith.mulf %229, %123 : vector<8x128xf32>
    %231 = vector.broadcast %57 : f32 to vector<8x128xf32>
    %232 = arith.addf %230, %231 : vector<8x128xf32>
    %233 = vector.broadcast %28 : f32 to vector<8x128xf32>
    %234 = arith.mulf %233, %126 : vector<8x128xf32>
    %235 = arith.addf %232, %234 : vector<8x128xf32>
    %236 = vector.broadcast %29 : f32 to vector<8x128xf32>
    %237 = arith.mulf %236, %129 : vector<8x128xf32>
    %238 = arith.addf %235, %237 : vector<8x128xf32>
    %239 = math.tanh %238 : vector<8x128xf32>
    %240 = vector.broadcast %30 : f32 to vector<8x128xf32>
    %241 = arith.mulf %240, %123 : vector<8x128xf32>
    %242 = vector.broadcast %58 : f32 to vector<8x128xf32>
    %243 = arith.addf %241, %242 : vector<8x128xf32>
    %244 = vector.broadcast %31 : f32 to vector<8x128xf32>
    %245 = arith.mulf %244, %126 : vector<8x128xf32>
    %246 = arith.addf %243, %245 : vector<8x128xf32>
    %247 = vector.broadcast %32 : f32 to vector<8x128xf32>
    %248 = arith.mulf %247, %129 : vector<8x128xf32>
    %249 = arith.addf %246, %248 : vector<8x128xf32>
    %250 = math.tanh %249 : vector<8x128xf32>
    %251 = vector.broadcast %33 : f32 to vector<8x128xf32>
    %252 = arith.mulf %251, %123 : vector<8x128xf32>
    %253 = vector.broadcast %59 : f32 to vector<8x128xf32>
    %254 = arith.addf %252, %253 : vector<8x128xf32>
    %255 = vector.broadcast %34 : f32 to vector<8x128xf32>
    %256 = arith.mulf %255, %126 : vector<8x128xf32>
    %257 = arith.addf %254, %256 : vector<8x128xf32>
    %258 = vector.broadcast %35 : f32 to vector<8x128xf32>
    %259 = arith.mulf %258, %129 : vector<8x128xf32>
    %260 = arith.addf %257, %259 : vector<8x128xf32>
    %261 = math.tanh %260 : vector<8x128xf32>
    %262 = vector.broadcast %36 : f32 to vector<8x128xf32>
    %263 = arith.mulf %262, %123 : vector<8x128xf32>
    %264 = vector.broadcast %60 : f32 to vector<8x128xf32>
    %265 = arith.addf %263, %264 : vector<8x128xf32>
    %266 = vector.broadcast %37 : f32 to vector<8x128xf32>
    %267 = arith.mulf %266, %126 : vector<8x128xf32>
    %268 = arith.addf %265, %267 : vector<8x128xf32>
    %269 = vector.broadcast %38 : f32 to vector<8x128xf32>
    %270 = arith.mulf %269, %129 : vector<8x128xf32>
    %271 = arith.addf %268, %270 : vector<8x128xf32>
    %272 = math.tanh %271 : vector<8x128xf32>
    %273 = vector.broadcast %39 : f32 to vector<8x128xf32>
    %274 = arith.mulf %273, %123 : vector<8x128xf32>
    %275 = vector.broadcast %61 : f32 to vector<8x128xf32>
    %276 = arith.addf %274, %275 : vector<8x128xf32>
    %277 = vector.broadcast %40 : f32 to vector<8x128xf32>
    %278 = arith.mulf %277, %126 : vector<8x128xf32>
    %279 = arith.addf %276, %278 : vector<8x128xf32>
    %280 = vector.broadcast %41 : f32 to vector<8x128xf32>
    %281 = arith.mulf %280, %129 : vector<8x128xf32>
    %282 = arith.addf %279, %281 : vector<8x128xf32>
    %283 = math.tanh %282 : vector<8x128xf32>
    %284 = vector.broadcast %42 : f32 to vector<8x128xf32>
    %285 = arith.mulf %284, %123 : vector<8x128xf32>
    %286 = vector.broadcast %62 : f32 to vector<8x128xf32>
    %287 = arith.addf %285, %286 : vector<8x128xf32>
    %288 = vector.broadcast %43 : f32 to vector<8x128xf32>
    %289 = arith.mulf %288, %126 : vector<8x128xf32>
    %290 = arith.addf %287, %289 : vector<8x128xf32>
    %291 = vector.broadcast %44 : f32 to vector<8x128xf32>
    %292 = arith.mulf %291, %129 : vector<8x128xf32>
    %293 = arith.addf %290, %292 : vector<8x128xf32>
    %294 = math.tanh %293 : vector<8x128xf32>
    %295 = vector.broadcast %45 : f32 to vector<8x128xf32>
    %296 = arith.mulf %295, %123 : vector<8x128xf32>
    %297 = vector.broadcast %63 : f32 to vector<8x128xf32>
    %298 = arith.addf %296, %297 : vector<8x128xf32>
    %299 = vector.broadcast %46 : f32 to vector<8x128xf32>
    %300 = arith.mulf %299, %126 : vector<8x128xf32>
    %301 = arith.addf %298, %300 : vector<8x128xf32>
    %302 = vector.broadcast %47 : f32 to vector<8x128xf32>
    %303 = arith.mulf %302, %129 : vector<8x128xf32>
    %304 = arith.addf %301, %303 : vector<8x128xf32>
    %305 = math.tanh %304 : vector<8x128xf32>
    %306 = vector.broadcast %64 : f32 to vector<8x128xf32>
    %307 = arith.mulf %306, %140 : vector<8x128xf32>
    %308 = vector.broadcast %65 : f32 to vector<8x128xf32>
    %309 = arith.mulf %308, %151 : vector<8x128xf32>
    %310 = vector.broadcast %66 : f32 to vector<8x128xf32>
    %311 = arith.mulf %310, %162 : vector<8x128xf32>
    %312 = vector.broadcast %67 : f32 to vector<8x128xf32>
    %313 = arith.mulf %312, %173 : vector<8x128xf32>
    %314 = vector.broadcast %68 : f32 to vector<8x128xf32>
    %315 = arith.mulf %314, %184 : vector<8x128xf32>
    %316 = arith.addf %307, %315 : vector<8x128xf32>
    %317 = vector.broadcast %69 : f32 to vector<8x128xf32>
    %318 = arith.mulf %317, %195 : vector<8x128xf32>
    %319 = arith.addf %309, %318 : vector<8x128xf32>
    %320 = vector.broadcast %70 : f32 to vector<8x128xf32>
    %321 = arith.mulf %320, %206 : vector<8x128xf32>
    %322 = arith.addf %311, %321 : vector<8x128xf32>
    %323 = vector.broadcast %71 : f32 to vector<8x128xf32>
    %324 = arith.mulf %323, %217 : vector<8x128xf32>
    %325 = arith.addf %313, %324 : vector<8x128xf32>
    %326 = vector.broadcast %72 : f32 to vector<8x128xf32>
    %327 = arith.mulf %326, %228 : vector<8x128xf32>
    %328 = arith.addf %316, %327 : vector<8x128xf32>
    %329 = vector.broadcast %73 : f32 to vector<8x128xf32>
    %330 = arith.mulf %329, %239 : vector<8x128xf32>
    %331 = arith.addf %319, %330 : vector<8x128xf32>
    %332 = vector.broadcast %74 : f32 to vector<8x128xf32>
    %333 = arith.mulf %332, %250 : vector<8x128xf32>
    %334 = arith.addf %322, %333 : vector<8x128xf32>
    %335 = vector.broadcast %75 : f32 to vector<8x128xf32>
    %336 = arith.mulf %335, %261 : vector<8x128xf32>
    %337 = arith.addf %325, %336 : vector<8x128xf32>
    %338 = vector.broadcast %76 : f32 to vector<8x128xf32>
    %339 = arith.mulf %338, %272 : vector<8x128xf32>
    %340 = arith.addf %328, %339 : vector<8x128xf32>
    %341 = vector.broadcast %77 : f32 to vector<8x128xf32>
    %342 = arith.mulf %341, %283 : vector<8x128xf32>
    %343 = arith.addf %331, %342 : vector<8x128xf32>
    %344 = vector.broadcast %78 : f32 to vector<8x128xf32>
    %345 = arith.mulf %344, %294 : vector<8x128xf32>
    %346 = arith.addf %334, %345 : vector<8x128xf32>
    %347 = vector.broadcast %79 : f32 to vector<8x128xf32>
    %348 = arith.mulf %347, %305 : vector<8x128xf32>
    %349 = arith.addf %337, %348 : vector<8x128xf32>
    %350 = vector.broadcast %112 : f32 to vector<8x128xf32>
    %351 = arith.addf %340, %350 : vector<8x128xf32>
    %352 = arith.addf %351, %343 : vector<8x128xf32>
    %353 = arith.addf %352, %346 : vector<8x128xf32>
    %354 = arith.addf %353, %349 : vector<8x128xf32>
    %355 = math.tanh %354 : vector<8x128xf32>
    %356 = vector.broadcast %80 : f32 to vector<8x128xf32>
    %357 = arith.mulf %356, %140 : vector<8x128xf32>
    %358 = vector.broadcast %81 : f32 to vector<8x128xf32>
    %359 = arith.mulf %358, %151 : vector<8x128xf32>
    %360 = vector.broadcast %82 : f32 to vector<8x128xf32>
    %361 = arith.mulf %360, %162 : vector<8x128xf32>
    %362 = vector.broadcast %83 : f32 to vector<8x128xf32>
    %363 = arith.mulf %362, %173 : vector<8x128xf32>
    %364 = vector.broadcast %84 : f32 to vector<8x128xf32>
    %365 = arith.mulf %364, %184 : vector<8x128xf32>
    %366 = arith.addf %357, %365 : vector<8x128xf32>
    %367 = vector.broadcast %85 : f32 to vector<8x128xf32>
    %368 = arith.mulf %367, %195 : vector<8x128xf32>
    %369 = arith.addf %359, %368 : vector<8x128xf32>
    %370 = vector.broadcast %86 : f32 to vector<8x128xf32>
    %371 = arith.mulf %370, %206 : vector<8x128xf32>
    %372 = arith.addf %361, %371 : vector<8x128xf32>
    %373 = vector.broadcast %87 : f32 to vector<8x128xf32>
    %374 = arith.mulf %373, %217 : vector<8x128xf32>
    %375 = arith.addf %363, %374 : vector<8x128xf32>
    %376 = vector.broadcast %88 : f32 to vector<8x128xf32>
    %377 = arith.mulf %376, %228 : vector<8x128xf32>
    %378 = arith.addf %366, %377 : vector<8x128xf32>
    %379 = vector.broadcast %89 : f32 to vector<8x128xf32>
    %380 = arith.mulf %379, %239 : vector<8x128xf32>
    %381 = arith.addf %369, %380 : vector<8x128xf32>
    %382 = vector.broadcast %90 : f32 to vector<8x128xf32>
    %383 = arith.mulf %382, %250 : vector<8x128xf32>
    %384 = arith.addf %372, %383 : vector<8x128xf32>
    %385 = vector.broadcast %91 : f32 to vector<8x128xf32>
    %386 = arith.mulf %385, %261 : vector<8x128xf32>
    %387 = arith.addf %375, %386 : vector<8x128xf32>
    %388 = vector.broadcast %92 : f32 to vector<8x128xf32>
    %389 = arith.mulf %388, %272 : vector<8x128xf32>
    %390 = arith.addf %378, %389 : vector<8x128xf32>
    %391 = vector.broadcast %93 : f32 to vector<8x128xf32>
    %392 = arith.mulf %391, %283 : vector<8x128xf32>
    %393 = arith.addf %381, %392 : vector<8x128xf32>
    %394 = vector.broadcast %94 : f32 to vector<8x128xf32>
    %395 = arith.mulf %394, %294 : vector<8x128xf32>
    %396 = arith.addf %384, %395 : vector<8x128xf32>
    %397 = vector.broadcast %95 : f32 to vector<8x128xf32>
    %398 = arith.mulf %397, %305 : vector<8x128xf32>
    %399 = arith.addf %387, %398 : vector<8x128xf32>
    %400 = vector.broadcast %113 : f32 to vector<8x128xf32>
    %401 = arith.addf %390, %400 : vector<8x128xf32>
    %402 = arith.addf %401, %393 : vector<8x128xf32>
    %403 = arith.addf %402, %396 : vector<8x128xf32>
    %404 = arith.addf %403, %399 : vector<8x128xf32>
    %405 = math.tanh %404 : vector<8x128xf32>
    %406 = vector.broadcast %96 : f32 to vector<8x128xf32>
    %407 = arith.mulf %406, %140 : vector<8x128xf32>
    %408 = vector.broadcast %97 : f32 to vector<8x128xf32>
    %409 = arith.mulf %408, %151 : vector<8x128xf32>
    %410 = vector.broadcast %98 : f32 to vector<8x128xf32>
    %411 = arith.mulf %410, %162 : vector<8x128xf32>
    %412 = vector.broadcast %99 : f32 to vector<8x128xf32>
    %413 = arith.mulf %412, %173 : vector<8x128xf32>
    %414 = vector.broadcast %100 : f32 to vector<8x128xf32>
    %415 = arith.mulf %414, %184 : vector<8x128xf32>
    %416 = arith.addf %407, %415 : vector<8x128xf32>
    %417 = vector.broadcast %101 : f32 to vector<8x128xf32>
    %418 = arith.mulf %417, %195 : vector<8x128xf32>
    %419 = arith.addf %409, %418 : vector<8x128xf32>
    %420 = vector.broadcast %102 : f32 to vector<8x128xf32>
    %421 = arith.mulf %420, %206 : vector<8x128xf32>
    %422 = arith.addf %411, %421 : vector<8x128xf32>
    %423 = vector.broadcast %103 : f32 to vector<8x128xf32>
    %424 = arith.mulf %423, %217 : vector<8x128xf32>
    %425 = arith.addf %413, %424 : vector<8x128xf32>
    %426 = vector.broadcast %104 : f32 to vector<8x128xf32>
    %427 = arith.mulf %426, %228 : vector<8x128xf32>
    %428 = arith.addf %416, %427 : vector<8x128xf32>
    %429 = vector.broadcast %105 : f32 to vector<8x128xf32>
    %430 = arith.mulf %429, %239 : vector<8x128xf32>
    %431 = arith.addf %419, %430 : vector<8x128xf32>
    %432 = vector.broadcast %106 : f32 to vector<8x128xf32>
    %433 = arith.mulf %432, %250 : vector<8x128xf32>
    %434 = arith.addf %422, %433 : vector<8x128xf32>
    %435 = vector.broadcast %107 : f32 to vector<8x128xf32>
    %436 = arith.mulf %435, %261 : vector<8x128xf32>
    %437 = arith.addf %425, %436 : vector<8x128xf32>
    %438 = vector.broadcast %108 : f32 to vector<8x128xf32>
    %439 = arith.mulf %438, %272 : vector<8x128xf32>
    %440 = arith.addf %428, %439 : vector<8x128xf32>
    %441 = vector.broadcast %109 : f32 to vector<8x128xf32>
    %442 = arith.mulf %441, %283 : vector<8x128xf32>
    %443 = arith.addf %431, %442 : vector<8x128xf32>
    %444 = vector.broadcast %110 : f32 to vector<8x128xf32>
    %445 = arith.mulf %444, %294 : vector<8x128xf32>
    %446 = arith.addf %434, %445 : vector<8x128xf32>
    %447 = vector.broadcast %111 : f32 to vector<8x128xf32>
    %448 = arith.mulf %447, %305 : vector<8x128xf32>
    %449 = arith.addf %437, %448 : vector<8x128xf32>
    %450 = vector.broadcast %114 : f32 to vector<8x128xf32>
    %451 = arith.addf %440, %450 : vector<8x128xf32>
    %452 = arith.addf %451, %443 : vector<8x128xf32>
    %453 = arith.addf %452, %446 : vector<8x128xf32>
    %454 = arith.addf %453, %449 : vector<8x128xf32>
    %455 = math.tanh %454 : vector<8x128xf32>
    %456 = vector.broadcast %115 : f32 to vector<8x128xf32>
    %457 = arith.mulf %456, %355 : vector<8x128xf32>
    %458 = vector.broadcast %118 : f32 to vector<8x128xf32>
    %459 = arith.addf %457, %458 : vector<8x128xf32>
    %460 = vector.broadcast %116 : f32 to vector<8x128xf32>
    %461 = arith.mulf %460, %405 : vector<8x128xf32>
    %462 = arith.addf %459, %461 : vector<8x128xf32>
    %463 = vector.broadcast %117 : f32 to vector<8x128xf32>
    %464 = arith.mulf %463, %455 : vector<8x128xf32>
    %465 = arith.addf %462, %464 : vector<8x128xf32>
    %c0_6 = arith.constant 0 : index
    %466 = arith.index_cast %120 : i32 to index
    %c0_7 = arith.constant 0 : index
    %467 = vector.load %arg3[%c0_6, %466, %c0_7] : memref<1x8x128xf32, #tpu.memory_space<vmem>>, vector<1x8x128xf32>
    %468 = vector.shape_cast %467 : vector<1x8x128xf32> to vector<8x128xf32>
    %469 = vector.shape_cast %465 : vector<8x128xf32> to vector<1x8x128xf32>
    tpu.vector_store %arg3[%c0_6, %466, %c0_7], %469 {strides = array<i32>} : memref<1x8x128xf32, #tpu.memory_space<vmem>>, vector<1x8x128xf32>,
    %c1_i32 = arith.constant 1 : i32
    return
  }
  func.func @transform_0(%arg0: i32) -> i32 {
    %c0_i32 = arith.constant 0 : i32
    %c0_i32_0 = arith.constant 0 : i32
    return %c0_i32 : i32
  }
  func.func @transform_1(%arg0: i32) -> (i32, i32, i32) {
    %c0_i32 = arith.constant 0 : i32
    %c0_i32_0 = arith.constant 0 : i32
    %c0_i32_1 = arith.constant 0 : i32
    return %c0_i32, %arg0, %c0_i32_0 : i32, i32, i32
  }
  func.func @transform_2(%arg0: i32) -> (i32, i32, i32) {
    %c0_i32 = arith.constant 0 : i32
    %c0_i32_0 = arith.constant 0 : i32
    %c0_i32_1 = arith.constant 0 : i32
    return %c0_i32, %arg0, %c0_i32_0 : i32, i32, i32
  }
}

</mosaic_0001>

<bundles_post_ra>
// kernel: sqnet_forward.1
= control target key start
LH: loop header
LB: loop body
LE: loop exit
PB: predicated region body
PF: predicated region fallthrough
CT: control target
= control target key end

     0   :  { %7 = vsyncpa [#allocation3], 0  ;;  %s999_s9 = smov 0   ;;  %s1001_s10 = smov 0   ;;  %s1685_s0 = inlined_call_operand.vmem [shape: f32[119], index: 0, kind: input, shape index: {}]   ;;  %s1686_s1 = inlined_call_operand.vmem [shape: f32[3,40,128], index: 1, kind: input, shape index: {}]   ;;  %s1687_s2 = inlined_call_operand.vmem [shape: f32[1,40,128], index: 2, kind: output, shape index: {}]  }
   0x1   :  { %s1003_s11 = smov 0  }
   0x2 LB: > { %s1015_s12 = sadd.s32 4294967295, %s981_s11   ;;  %s1018_s13 = sadd.s32 1, %s981_s11   ;;  %s981_s11 = sphi %s1003_s11, %s1692_s11   ;;  %s977_s10 = sphi %s1001_s10, %s1691_s10   ;;  %s973_s9 = sphi %s999_s9, %s1690_s9  }
   0x3   : > { %s38_s14 = ssub.s32 %s981_s11, %s1018_s13  ;;  %s41_s15 = sadd.s32 1, %s977_s10 }
   0x4   : > { %p39_p0 = scmp.eq.s32.totalorder %s38_s14, 0  ;;  %p48_p1 = scmp.ne.s32.totalorder %s977_s10, %s973_s9 }
   0x5   : > { %p49_p2 = scmp.eq.s32.totalorder %s981_s11, 0  ;;  %p736_p3 = scmp.ge.s32.totalorder %s981_s11, 1 }
   0x6   : > { %s1028_s16 = scalar_select %p39_p0, %s977_s10, %s41_s15  }
   0x7   : > { %p1030_p4 = por %p49_p2, %p48_p1  ;;  %p91_p5 = scmp.lt.s32.totalorder %s981_s11, 6 }
   0x8   : > { %p875_p6 = scmp.eq.s32.totalorder %s1015_s12, 0  ;;  %s104_s21 = sshll.u32 %s1685_s0, 4  ;;  %s105_s21 = int_to_ptr.vmem [resolvable:$true] %s104_s21 }
   0x9   : > { %p1036_p7 = pnand %p736_p3, %p91_p5  ;;  %s940_s22 = scalar_lea.vmem %s105_s21, 16 }
   0xa   : > { %p941_p10 = scmp.ne.s32.totalorder %s105_s21, %s940_s22  ;;  %p948_p0 = scmp.lt.s32.totalorder %s105_s21, %s105_s21 }
   0xb   : > { %p871_p8 = pneg %p1036_p7  ;;  %p949_p1 = scmp.lt.s32.totalorder %s940_s22, %s940_s22 }
   0xd   : > { %p872_p9 = pnand %p875_p6, %p871_p8  ;;  %p950_p2 = por %p949_p1, %p948_p0 }
   0xf   : > { %p942_p11 = pneg %p872_p9 }
  0x11   : > { %p943_p12 = pnand %p942_p11, %p941_p10 }
  0x13   : > { %p944_p13 = pneg %p943_p12 }
  0x15   : > { %p951_p3 = pnand %p950_p2, %p944_p13 }
  0x17   : > { %954 = shalt.err (!%p951_p3)
}
  0x18   : > { %s983_s23 = smov [#allocation2]   ;;  %p738_p5 = scmp.ge.s32.totalorder %s981_s11, 5 }
  0x19   : > { %874 = dma.vmem_to_smem (!%p872_p9), %s105_s21, 16, %s983_s23, [#allocation3]  }
  0x1a   : > { %111 = sbr.rel (%p738_p5) target bundleno = 40 (0x28), region = 20 }
  0x21   : > { %114 = sbr.rel (!%p1030_p4) target bundleno = 40 (0x28), region = 24  ;;  %s116_s24 = sand.u32 (%p1030_p4), 1, %s977_s10  }
  0x22   : > { %s739_s25 = sshll.u32 (%p1030_p4), %s981_s11, 3  ;;  %s865_s26 = smul.u32 (%p1030_p4), 24, %s116_s24 }
  0x23   : > { %s120_s29 = scalar_lea.vmem (%p1030_p4), %s1686_s1, %s739_s25 }
  0x24   : > { %v152_v0 = vld [vmem:[%s120_s29] sm:$0xff] (%p1030_p4)  ;;  %v154_v1 = vld [vmem:[%s120_s29 + $0x28] sm:$0xff] (%p1030_p4)  ;;  %v156_v2 = vld [vmem:[%s120_s29 + $0x50] sm:$0xff] (%p1030_p4)  ;;  %s118_s30 = scalar_lea.vmem (%p1030_p4), [#allocation4], %s865_s26 }
  0x25   : > { %153 = vst [vmem:[%s118_s30] sm:$0xff] (%p1030_p4), %v152_v0  ;;  %155 = vst [vmem:[%s118_s30 + $0x8] sm:$0xff] (%p1030_p4), %v154_v1 }
  0x26   : > { %157 = vst [vmem:[%s118_s30 + $0x10] sm:$0xff] (%p1030_p4), %v156_v2 }
  0x28 PF: > { %166 = sbr.rel (%p1036_p7) target bundleno = 164 (0xa4), region = 62 }
  0x2f   : > { %968 = dma.done.wait (%p875_p6), [#allocation3], 16  }
  0x30   : > { %970 = vsyncadd (%p875_p6), [#allocation3], 4294967280  ;;  %s173_s3 = sand.u32 1, %s973_s9  }
  0x31   : > { %s866_s4 = smul.u32 24, %s173_s3 }
  0x33   : > { %s175_s5 = scalar_lea.vmem [#allocation4], %s866_s4 }
  0x34   : > { %179 = sfence }
  0x35   : > { %s198_s6 = sld [smem:[#allocation2]]  ;;  %s743_s7 = sld [smem:[#allocation2 + $0x1]]  ;;  %v1074_v3 = vld [vmem:[%s175_s5] sm:$0xff]  ;;  %v1076_v4 = vld [vmem:[%s175_s5 + $0x8] sm:$0xff]  ;;  %v1082_v7 = vld [vmem:[%s175_s5 + $0x10] sm:$0xff] }
  0x36   : > { %s744_s8 = sld [smem:[#allocation2 + $0x2]]  ;;  %s745_s11 = sld [smem:[#allocation2 + $0x3]] }
  0x37   : > { %s746_s14 = sld [smem:[#allocation2 + $0x4]]  ;;  %s1062_s15 = sld [smem:[#allocation2 + $0x5]] }
  0x38   : > { %s1064_s17 = sld [smem:[#allocation2 + $0x6]]  ;;  %s1066_s18 = sld [smem:[#allocation2 + $0x7]] }
  0x39   : > { %s1068_s19 = sld [smem:[#allocation2 + $0x8]]  ;;  %s1070_s20 = sld [smem:[#allocation2 + $0x9]] }
  0x3a   : > { %s1072_s21 = sld [smem:[#allocation2 + $0xa]]  ;;  %s1078_s9 = sld [smem:[#allocation2 + $0xb]] }
  0x3b   : > { %v324_v5 = vstv %s198_s6  ;;  %v328_v6 = vstv %s743_s7  ;;  %s1080_s22 = sld [smem:[#allocation2 + $0xc]]  ;;  %s1084_s23 = sld [smem:[#allocation2 + $0xd]] }
  0x3c   : > { %v331_v8 = vstv %s744_s8  ;;  %s1086_s24 = sld [smem:[#allocation2 + $0xe]]  ;;  %v335_v9 = vstv %s745_s11  ;;  %s1088_s25 = sld [smem:[#allocation2 + $0xf]]  ;;  %v1093_v11 = vmul.f32 %v324_v5, %v1074_v3  ;;  %v1096_v12 = vmul.f32 %v1076_v4, %v328_v6 }
  0x3d   : > { %v339_v10 = vstv %s746_s14  ;;  %s1090_s26 = sld [smem:[#allocation2 + $0x10]]  ;;  %v342_v13 = vstv %s1062_s15  ;;  %s1099_s27 = sld [smem:[#allocation2 + $0x11]]  ;;  %v1104_v14 = vmul.f32 %v1082_v7, %v331_v8  ;;  %v1107_v15 = vmul.f32 %v335_v9, %v1074_v3 }
  0x3e   : > { %s1101_s28 = sld [smem:[#allocation2 + $0x12]]  ;;  %v1110_v16 = vmul.f32 %v1076_v4, %v339_v10  ;;  %v346_v17 = vstv %s1064_s17  ;;  %s1113_s29 = sld [smem:[#allocation2 + $0x13]]  ;;  %v1118_v18 = vmul.f32 %v1082_v7, %v342_v13  ;;  %v350_v20 = vstv %s1066_s18 }
  0x3f   : > { %s1115_s30 = sld [smem:[#allocation2 + $0x14]]  ;;  %v1121_v19 = vmul.f32 %v346_v17, %v1074_v3  ;;  %v353_v21 = vstv %s1068_s19  ;;  %s1125_s3 = sld [smem:[#allocation2 + $0x15]]  ;;  %v1130_v22 = vmul.f32 %v1076_v4, %v350_v20  ;;  %v357_v24 = vstv %s1070_s20 }
  0x40   : > { %s1127_s4 = sld [smem:[#allocation2 + $0x16]]  ;;  %v1133_v23 = vmul.f32 %v1082_v7, %v353_v21  ;;  %v361_v25 = vstv %s1072_s21  ;;  %s1137_s5 = sld [smem:[#allocation2 + $0x17]]  ;;  %v1142_v26 = vmul.f32 %v357_v24, %v1074_v3  ;;  %v364_v28 = vstv %s1078_s9 }
  0x41   : > { %s1139_s6 = sld [smem:[#allocation2 + $0x18]]  ;;  %v1145_v27 = vmul.f32 %v1076_v4, %v361_v25  ;;  %v368_v29 = vstv %s1080_s22  ;;  %s1149_s7 = sld [smem:[#allocation2 + $0x19]]  ;;  %v1154_v30 = vmul.f32 %v1082_v7, %v364_v28  ;;  %v372_v32 = vstv %s1084_s23 }
  0x42   : > { %s1151_s8 = sld [smem:[#allocation2 + $0x1a]]  ;;  %v1157_v31 = vmul.f32 %v368_v29, %v1074_v3  ;;  %v375_v33 = vstv %s1086_s24  ;;  %s1161_s11 = sld [smem:[#allocation2 + $0x1b]]  ;;  %v1166_v34 = vmul.f32 %v1076_v4, %v372_v32  ;;  %v379_v36 = vstv %s1088_s25 }
  0x43   : > { %s1163_s14 = sld [smem:[#allocation2 + $0x1c]]  ;;  %v1169_v35 = vmul.f32 %v1082_v7, %v375_v33  ;;  %v383_v37 = vstv %s1090_s26  ;;  %s1173_s15 = sld [smem:[#allocation2 + $0x1d]]  ;;  %v1178_v38 = vmul.f32 %v379_v36, %v1074_v3  ;;  %v386_v40 = vstv %s1099_s27 }
  0x44   : > { %s1175_s17 = sld [smem:[#allocation2 + $0x1e]]  ;;  %v1181_v39 = vmul.f32 %v1076_v4, %v383_v37  ;;  %v390_v41 = vstv %s1101_s28  ;;  %s1185_s18 = sld [smem:[#allocation2 + $0x1f]]  ;;  %v1190_v42 = vmul.f32 %v1082_v7, %v386_v40  ;;  %v394_v44 = vstv %s1113_s29 }
  0x45   : > { %s1187_s19 = sld [smem:[#allocation2 + $0x20]]  ;;  %v1193_v43 = vmul.f32 %v390_v41, %v1074_v3  ;;  %v397_v45 = vstv %s1115_s30  ;;  %s1197_s20 = sld [smem:[#allocation2 + $0x21]]  ;;  %v1202_v46 = vmul.f32 %v1076_v4, %v394_v44  ;;  %v401_v48 = vstv %s1125_s3 }
  0x46   : > { %s1199_s21 = sld [smem:[#allocation2 + $0x22]]  ;;  %v1205_v47 = vmul.f32 %v1082_v7, %v397_v45  ;;  %v405_v49 = vstv %s1127_s4  ;;  %s1209_s9 = sld [smem:[#allocation2 + $0x23]]  ;;  %v1214_v50 = vmul.f32 %v401_v48, %v1074_v3  ;;  %v408_v52 = vstv %s1137_s5 }
  0x47   : > { %s1211_s22 = sld [smem:[#allocation2 + $0x24]]  ;;  %v1217_v51 = vmul.f32 %v1076_v4, %v405_v49  ;;  %v412_v53 = vstv %s1139_s6  ;;  %s1221_s23 = sld [smem:[#allocation2 + $0x25]]  ;;  %v1226_v54 = vmul.f32 %v1082_v7, %v408_v52  ;;  %v416_v56 = vstv %s1149_s7 }
  0x48   : > { %s1223_s24 = sld [smem:[#allocation2 + $0x26]]  ;;  %v1229_v55 = vmul.f32 %v412_v53, %v1074_v3  ;;  %v419_v57 = vstv %s1151_s8  ;;  %s1233_s25 = sld [smem:[#allocation2 + $0x27]]  ;;  %v1238_v58 = vmul.f32 %v1076_v4, %v416_v56  ;;  %v423_v60 = vstv %s1161_s11 }
  0x49   : > { %s1235_s26 = sld [smem:[#allocation2 + $0x28]]  ;;  %v1241_v59 = vmul.f32 %v1082_v7, %v419_v57  ;;  %v427_v61 = vstv %s1163_s14  ;;  %s1245_s27 = sld [smem:[#allocation2 + $0x29]]  ;;  %v1250_v62 = vmul.f32 %v423_v60, %v1074_v3  ;;  %v430_v0 = vstv %s1173_s15 }
  0x4a   : > { %s1247_s28 = sld [smem:[#allocation2 + $0x2a]]  ;;  %v1253_v63 = vmul.f32 %v1076_v4, %v427_v61  ;;  %v434_v1 = vstv %s1175_s17  ;;  %s1257_s29 = sld [smem:[#allocation2 + $0x2b]]  ;;  %v1262_v2 = vmul.f32 %v1082_v7, %v430_v0  ;;  %v438_v6 = vstv %s1185_s18 }
  0x4b   : > { %s1259_s30 = sld [smem:[#allocation2 + $0x2c]]  ;;  %v1265_v5 = vmul.f32 %v434_v1, %v1074_v3  ;;  %v441_v8 = vstv %s1187_s19  ;;  %s1269_s3 = sld [smem:[#allocation2 + $0x2d]]  ;;  %v1274_v9 = vmul.f32 %v1076_v4, %v438_v6  ;;  %v445_v13 = vstv %s1197_s20 }
  0x4c   : > { %s1271_s4 = sld [smem:[#allocation2 + $0x2e]]  ;;  %v1277_v10 = vmul.f32 %v1082_v7, %v441_v8  ;;  %v449_v17 = vstv %s1199_s21  ;;  %s1281_s5 = sld [smem:[#allocation2 + $0x2f]]  ;;  %v1286_v20 = vmul.f32 %v445_v13, %v1074_v3  ;;  %v452_v24 = vstv %s1209_s9 }
  0x4d   : > { %s1283_s6 = sld [smem:[#allocation2 + $0x30]]  ;;  %v1289_v21 = vmul.f32 %v1076_v4, %v449_v17  ;;  %v456_v25 = vstv %s1211_s22  ;;  %s1293_s7 = sld [smem:[#allocation2 + $0x31]]  ;;  %v1298_v28 = vmul.f32 %v1082_v7, %v452_v24  ;;  %v460_v32 = vstv %s1221_s23 }
  0x4e   : > { %s1295_s8 = sld [smem:[#allocation2 + $0x32]]  ;;  %v1301_v29 = vmul.f32 %v456_v25, %v1074_v3  ;;  %v463_v33 = vstv %s1223_s24  ;;  %s1305_s11 = sld [smem:[#allocation2 + $0x33]]  ;;  %v1310_v36 = vmul.f32 %v1076_v4, %v460_v32  ;;  %v467_v40 = vstv %s1233_s25 }
  0x4f   : > { %s1307_s14 = sld [smem:[#allocation2 + $0x34]]  ;;  %v1313_v37 = vmul.f32 %v1082_v7, %v463_v33  ;;  %v471_v41 = vstv %s1235_s26  ;;  %s1317_s15 = sld [smem:[#allocation2 + $0x35]]  ;;  %v1322_v44 = vmul.f32 %v467_v40, %v1074_v3  ;;  %v474_v48 = vstv %s1245_s27 }
  0x50   : > { %s1319_s17 = sld [smem:[#allocation2 + $0x36]]  ;;  %v1325_v45 = vmul.f32 %v1076_v4, %v471_v41  ;;  %v478_v49 = vstv %s1247_s28  ;;  %s1329_s18 = sld [smem:[#allocation2 + $0x37]]  ;;  %v1332_v52 = vmul.f32 %v1082_v7, %v474_v48  ;;  %v482_v56 = vstv %s1257_s29 }
  0x51   : > { %v1335_v53 = vmul.f32 %v478_v49, %v1074_v3  ;;  %v485_v57 = vstv %s1259_s30  ;;  %v1340_v60 = vmul.f32 %v1076_v4, %v482_v56  ;;  %v489_v0 = vstv %s1269_s3  ;;  %s1347_s19 = sld [smem:[#allocation2 + $0x38]]  ;;  %s1357_s20 = sld [smem:[#allocation2 + $0x39]] }
  0x52   : > { %v1343_v61 = vmul.f32 %v1082_v7, %v485_v57  ;;  %v493_v1 = vstv %s1271_s4  ;;  %v1351_v8 = vmul.f32 %v489_v0, %v1074_v3  ;;  %v496_v17 = vstv %s1281_s5  ;;  %s1365_s21 = sld [smem:[#allocation2 + $0x3a]]  ;;  %s1371_s9 = sld [smem:[#allocation2 + $0x3b]] }
  0x53   : > { %v326_v6 = vstv %s1283_s6  ;;  %v1354_v13 = vmul.f32 %v1076_v4, %v493_v1  ;;  %v337_v25 = vstv %s1293_s7  ;;  %v1363_v33 = vmul.f32 %v1082_v7, %v496_v17  ;;  %s1381_s22 = sld [smem:[#allocation2 + $0x3c]]  ;;  %s1391_s23 = sld [smem:[#allocation2 + $0x3d]] }
  0x54   : > { %v327_v24 = vadd.f32 %v326_v6, %v1093_v11  ;;  %v348_v32 = vstv %s1295_s8  ;;  %v338_v3 = vadd.f32 %v337_v25, %v1107_v15  ;;  %v359_v4 = vstv %s1305_s11  ;;  %s1393_s24 = sld [smem:[#allocation2 + $0x3e]]  ;;  %s1401_s25 = sld [smem:[#allocation2 + $0x3f]] }
  0x55   : > { %v349_v40 = vadd.f32 %v348_v32, %v1121_v19  ;;  %v370_v41 = vstv %s1307_s14  ;;  %v360_v11 = vadd.f32 %v359_v4, %v1142_v26  ;;  %v381_v56 = vstv %s1317_s15  ;;  %s1403_s26 = sld [smem:[#allocation2 + $0x40]]  ;;  %s1411_s27 = sld [smem:[#allocation2 + $0x41]] }
  0x56   : > { %v330_v48 = vadd.f32 %v1096_v12, %v327_v24  ;;  %v371_v49 = vadd.f32 %v370_v41, %v1157_v31  ;;  %v341_v7 = vadd.f32 %v1110_v16, %v338_v3  ;;  %v382_v15 = vadd.f32 %v381_v56, %v1178_v38  ;;  %s1413_s28 = sld [smem:[#allocation2 + $0x42]]  ;;  %s1421_s29 = sld [smem:[#allocation2 + $0x43]] }
  0x57   : > { %v352_v57 = vadd.f32 %v1130_v22, %v349_v40  ;;  %v392_v0 = vstv %s1319_s17  ;;  %v363_v1 = vadd.f32 %v1145_v27, %v360_v11  ;;  %v403_v6 = vstv %s1329_s18  ;;  %s1423_s30 = sld [smem:[#allocation2 + $0x44]]  ;;  %s1428_s3 = sld [smem:[#allocation2 + $0x45]] }
  0x58   : > { %v333_v19 = vadd.f32 %v1104_v14, %v330_v48  ;;  %v374_v12 = vadd.f32 %v1166_v34, %v371_v49  ;;  %v393_v26 = vadd.f32 %v392_v0, %v1193_v43  ;;  %v344_v31 = vadd.f32 %v1118_v18, %v341_v7  ;;  %s1433_s4 = sld [smem:[#allocation2 + $0x46]]  ;;  %s1435_s5 = sld [smem:[#allocation2 + $0x47]] }
  0x59   : > { %v355_v16 = vadd.f32 %v1133_v23, %v352_v57  ;;  %v385_v22 = vadd.f32 %v1181_v39, %v382_v15  ;;  %v366_v14 = vadd.f32 %v1154_v30, %v363_v1  ;;  %v404_v23 = vadd.f32 %v403_v6, %v1214_v50  ;;  %s1440_s6 = sld [smem:[#allocation2 + $0x48]]  ;;  %s1447_s7 = sld [smem:[#allocation2 + $0x49]] }
  0x5a   : > { %902 = vtanh.f32 %v333_v19  ;;  %v377_v27 = vadd.f32 %v1169_v35, %v374_v12  ;;  %v396_v34 = vadd.f32 %v1202_v46, %v393_v26  ;;  %v414_v38 = vstv %s1347_s19  ;;  %s1449_s8 = sld [smem:[#allocation2 + $0x4a]]  ;;  %s1456_s11 = sld [smem:[#allocation2 + $0x4b]] }
  0x5b   : > { %904 = vtanh.f32 %v344_v31  ;;  %v388_v18 = vadd.f32 %v1190_v42, %v385_v22  ;;  %v415_v30 = vadd.f32 %v414_v38, %v1229_v55  ;;  %v425_v43 = vstv %s1357_s20  ;;  %s1463_s14 = sld [smem:[#allocation2 + $0x4c]]  ;;  %s1465_s15 = sld [smem:[#allocation2 + $0x4d]] }
  0x5c   : > { %906 = vtanh.f32 %v355_v16  ;;  %v399_v39 = vadd.f32 %v1205_v47, %v396_v34  ;;  %v407_v35 = vadd.f32 %v1217_v51, %v404_v23  ;;  %v426_v46 = vadd.f32 %v425_v43, %v1250_v62  ;;  %s1473_s17 = sld [smem:[#allocation2 + $0x4e]]  ;;  %s1475_s18 = sld [smem:[#allocation2 + $0x4f]] }
  0x5d   : > { %908 = vtanh.f32 %v366_v14  ;;  %v436_v42 = vstv %s1365_s21  ;;  %v418_v50 = vadd.f32 %v1238_v58, %v415_v30  ;;  %v447_v47 = vstv %s1371_s9  ;;  %s1482_s19 = sld [smem:[#allocation2 + $0x50]]  ;;  %s1484_s20 = sld [smem:[#allocation2 + $0x51]] }
  0x5e   : > { %910 = vtanh.f32 %v377_v27  ;;  %v437_v17 = vadd.f32 %v436_v42, %v1265_v5  ;;  %v410_v55 = vadd.f32 %v1226_v54, %v407_v35  ;;  %v429_v24 = vadd.f32 %v1253_v63, %v426_v46  ;;  %s1492_s21 = sld [smem:[#allocation2 + $0x52]]  ;;  %s1499_s9 = sld [smem:[#allocation2 + $0x53]] }
  0x5f   : > { %912 = vtanh.f32 %v388_v18  ;;  %v448_v51 = vadd.f32 %v447_v47, %v1286_v20  ;;  %v421_v62 = vadd.f32 %v1241_v59, %v418_v50  ;;  %v458_v5 = vstv %s1381_s22  ;;  %s1506_s22 = sld [smem:[#allocation2 + $0x54]]  ;;  %p194_p4 = scmp.lt.s32.totalorder %s1015_s12, 4 }
  0x60   : > { %914 = vtanh.f32 %v399_v39  ;;  %v440_v58 = vadd.f32 %v1274_v9, %v437_v17  ;;  %v432_v54 = vadd.f32 %v1262_v2, %v429_v24  ;;  %v459_v20 = vadd.f32 %v458_v5, %v1301_v29 }
  0x61   : > { %916 = vtanh.f32 %v410_v55  ;;  %v451_v63 = vadd.f32 %v1289_v21, %v448_v51  ;;  %v469_v9 = vstv %s1391_s23  ;;  %v480_v25 = vstv %s1393_s24  ;;  %s1508_s23 = sld [smem:[#allocation2 + $0x55]]  ;;  %s1514_s24 = sld [smem:[#allocation2 + $0x56]] }
  0x62   : > { %918 = vtanh.f32 %v421_v62  ;;  %v443_v59 = vadd.f32 %v1277_v10, %v440_v58  ;;  %v462_v21 = vadd.f32 %v1310_v36, %v459_v20  ;;  %v470_v29 = vadd.f32 %v469_v9, %v1322_v44  ;;  %s1694_s12 = smov (!%p194_p4, %s1015_s12), 4 }
  0x63   : > { %920 = vtanh.f32 %v432_v54  ;;  %v454_v2 = vadd.f32 %v1298_v28, %v451_v63  ;;  %v481_v10 = vadd.f32 %v480_v25, %v1335_v53  ;;  %v491_v3 = vstv %s1401_s25  ;;  %s1516_s25 = sld [smem:[#allocation2 + $0x57]] }
  0x64   : > { %v1445_v32 = vpop.eup %902  ;;  %922 = vtanh.f32 %v443_v59  ;;  %v500_v40 = vstv %s1403_s26  ;;  %v465_v28 = vadd.f32 %v1313_v37, %v462_v21  ;;  %v473_v36 = vadd.f32 %v1325_v45, %v470_v29  ;;  %s1524_s26 = sld [smem:[#allocation2 + $0x58]] }
  0x65   : > { %v1454_v4 = vpop.eup %904  ;;  %924 = vtanh.f32 %v454_v2  ;;  %v492_v44 = vadd.f32 %v491_v3, %v1351_v8  ;;  %v484_v53 = vadd.f32 %v1340_v60, %v481_v10  ;;  %v501_v48 = vmul.f32 %v1445_v32, %v500_v40 }
  0x66   : > { %v1461_v41 = vpop.eup %906  ;;  %v502_v11 = vstv %s1411_s27  ;;  %v504_v49 = vstv %s1413_s28  ;;  %926 = vtanh.f32 %v465_v28  ;;  %v476_v37 = vadd.f32 %v1332_v52, %v473_v36  ;;  %s1526_s27 = sld [smem:[#allocation2 + $0x70]]  ;;  %s1540_s28 = sld [smem:[#allocation2 + $0x59]] }
  0x67   : > { %v1471_v56 = vpop.eup %908  ;;  %v495_v45 = vadd.f32 %v1354_v13, %v492_v44  ;;  %v503_v8 = vmul.f32 %v1454_v4, %v502_v11  ;;  %v487_v7 = vadd.f32 %v1343_v61, %v484_v53  ;;  %v505_v57 = vmul.f32 %v1461_v41, %v504_v49 }
  0x68   : > { %v1480_v60 = vpop.eup %910  ;;  %v506_v15 = vstv %s1421_s29  ;;  %v508_v0 = vstv %s1423_s30  ;;  %928 = vtanh.f32 %v476_v37  ;;  %v511_v61 = vstv %s1428_s3  ;;  %s1547_s29 = sld [smem:[#allocation2 + $0x5a]]  ;;  %s1552_s30 = sld [smem:[#allocation2 + $0x5b]] }
  0x69   : > { %v1490_v52 = vpop.eup %912  ;;  %v498_v13 = vadd.f32 %v1363_v33, %v495_v45  ;;  %v507_v19 = vmul.f32 %v1471_v56, %v506_v15  ;;  %v509_v1 = vmul.f32 %v1480_v60, %v508_v0  ;;  %930 = vtanh.f32 %v487_v7  ;;  %s1559_s3 = sld [smem:[#allocation2 + $0x5c]] }
  0x6a   : > { %v1497_v12 = vpop.eup %914  ;;  %v514_v26 = vstv %s1433_s4  ;;  %v517_v31 = vstv %s1435_s5  ;;  %v512_v22 = vmul.f32 %v1490_v52, %v511_v61  ;;  %v520_v34 = vstv %s1440_s6  ;;  %s1561_s4 = sld [smem:[#allocation2 + $0x5d]]  ;;  %s1569_s5 = sld [smem:[#allocation2 + $0x5e]] }
  0x6b   : > { %v1504_v16 = vpop.eup %916  ;;  %932 = vtanh.f32 %v498_v13  ;;  %v510_v33 = vadd.f32 %v509_v1, %v501_v48  ;;  %v515_v6 = vmul.f32 %v1497_v12, %v514_v26  ;;  %v523_v18 = vstv %s1447_s7  ;;  %s1576_s6 = sld [smem:[#allocation2 + $0x5f]]  ;;  %s1578_s7 = sld [smem:[#allocation2 + $0x71]] }
  0x6c   : > { %v1512_v14 = vpop.eup %918  ;;  %v518_v27 = vmul.f32 %v1504_v16, %v517_v31  ;;  %v526_v23 = vstv %s1449_s8  ;;  %v513_v39 = vadd.f32 %v512_v22, %v503_v8  ;;  %v529_v35 = vstv %s1456_s11  ;;  %s1584_s8 = sld [smem:[#allocation2 + $0x60]]  ;;  %s1587_s11 = sld [smem:[#allocation2 + $0x61]] }
  0x6d   : > { %v1522_v38 = vpop.eup %920  ;;  %v516_v30 = vadd.f32 %v515_v6, %v505_v57  ;;  %v521_v43 = vmul.f32 %v1512_v14, %v520_v34  ;;  %v532_v17 = vstv %s1463_s14  ;;  %v535_v47 = vstv %s1465_s15  ;;  %s1589_s14 = sld [smem:[#allocation2 + $0x62]]  ;;  %s1595_s15 = sld [smem:[#allocation2 + $0x63]] }
  0x6e   : > { %v1530_v46 = vpop.eup %922  ;;  %v519_v42 = vadd.f32 %v518_v27, %v507_v19  ;;  %v524_v50 = vmul.f32 %v1522_v38, %v523_v18  ;;  %v538_v62 = vstv %s1473_s17  ;;  %v541_v58 = vstv %s1475_s18  ;;  %s1597_s17 = sld [smem:[#allocation2 + $0x64]]  ;;  %s1601_s18 = sld [smem:[#allocation2 + $0x65]] }
  0x6f   : > { %v1535_v55 = vpop.eup %924  ;;  %v522_v24 = vadd.f32 %v521_v43, %v510_v33  ;;  %v527_v51 = vmul.f32 %v1530_v46, %v526_v23  ;;  %v550_v63 = vstv %s1482_s19  ;;  %v552_v20 = vstv %s1484_s20  ;;  %s1603_s19 = sld [smem:[#allocation2 + $0x66]]  ;;  %s1607_s20 = sld [smem:[#allocation2 + $0x67]] }
  0x70   : > { %v525_v5 = vadd.f32 %v524_v50, %v513_v39  ;;  %v530_v54 = vmul.f32 %v1535_v55, %v529_v35  ;;  %v1545_v59 = vpop.eup %926  ;;  %v551_v25 = vmul.f32 %v1445_v32, %v550_v63  ;;  %v553_v2 = vmul.f32 %v1454_v4, %v552_v20 }
  0x71   : > { %v528_v9 = vadd.f32 %v527_v51, %v516_v30  ;;  %v554_v21 = vstv %s1492_s21  ;;  %v533_v10 = vmul.f32 %v1545_v59, %v532_v17  ;;  %v556_v40 = vstv %s1499_s9  ;;  %s1609_s21 = sld [smem:[#allocation2 + $0x68]]  ;;  %s1616_s9 = sld [smem:[#allocation2 + $0x69]] }
  0x72   : > { %v531_v29 = vadd.f32 %v530_v54, %v519_v42  ;;  %v555_v3 = vmul.f32 %v1461_v41, %v554_v21  ;;  %v1557_v28 = vpop.eup %928  ;;  %v544_v36 = vstv %s1526_s27  ;;  %v557_v44 = vmul.f32 %v1471_v56, %v556_v40  ;;  %s1638_s27 = sld [smem:[#allocation2 + $0x6f]] }
  0x73   : > { %v558_v53 = vstv %s1506_s22  ;;  %v561_v48 = vstv %s1508_s23  ;;  %v1567_v11 = vpop.eup %930  ;;  %v534_v49 = vadd.f32 %v533_v10, %v522_v24  ;;  %v536_v37 = vmul.f32 %v1557_v28, %v535_v47  ;;  %s1618_s22 = sld [smem:[#allocation2 + $0x6a]]  ;;  %s1624_s23 = sld [smem:[#allocation2 + $0x6b]] }
  0x74   : > { %v559_v45 = vmul.f32 %v1480_v60, %v558_v53  ;;  %v562_v8 = vmul.f32 %v1490_v52, %v561_v48  ;;  %v539_v57 = vmul.f32 %v1567_v11, %v538_v62  ;;  %v564_v15 = vstv %s1514_s24  ;;  %s1626_s24 = sld [smem:[#allocation2 + $0x6c]] }
  0x75   : > { %v1574_v7 = vpop.eup %932  ;;  %v567_v0 = vstv %s1516_s25  ;;  %v570_v13 = vstv %s1524_s26  ;;  %v537_v19 = vadd.f32 %v536_v37, %v525_v5  ;;  %v545_v61 = vadd.f32 %v544_v36, %v534_v49  ;;  %s1632_s25 = sld [smem:[#allocation2 + $0x6d]]  ;;  %s1636_s26 = sld [smem:[#allocation2 + $0x6e]] }
  0x76   : > { %v542_v1 = vmul.f32 %v1574_v7, %v541_v58  ;;  %v560_v26 = vadd.f32 %v559_v45, %v551_v25  ;;  %v540_v31 = vadd.f32 %v539_v57, %v528_v9  ;;  %v563_v33 = vadd.f32 %v562_v8, %v553_v2 }
  0x77   : > { %v565_v22 = vmul.f32 %v1497_v12, %v564_v15  ;;  %v568_v6 = vmul.f32 %v1504_v16, %v567_v0  ;;  %v546_v34 = vadd.f32 %v545_v61, %v537_v19  ;;  %v571_v18 = vmul.f32 %v1512_v14, %v570_v13 }
  0x78   : > { %v543_v27 = vadd.f32 %v542_v1, %v531_v29  ;;  %v573_v23 = vstv %s1540_s28  ;;  %v576_v35 = vstv %s1547_s29  ;;  %v579_v47 = vstv %s1552_s30  ;;  %s1646_s28 = sld [smem:[#allocation2 + $0x72]]  ;;  %s857_s29 = sld [smem:[#allocation2 + $0x73]] }
  0x79   : > { %v566_v39 = vadd.f32 %v565_v22, %v555_v3  ;;  %v569_v30 = vadd.f32 %v568_v6, %v557_v44  ;;  %v574_v43 = vmul.f32 %v1522_v38, %v573_v23  ;;  %v547_v42 = vadd.f32 %v546_v34, %v540_v31  ;;  %s858_s30 = sld [smem:[#allocation2 + $0x74]] }
  0x7a   : > { %v572_v50 = vadd.f32 %v571_v18, %v560_v26  ;;  %v577_v17 = vmul.f32 %v1530_v46, %v576_v35  ;;  %v580_v51 = vmul.f32 %v1535_v55, %v579_v47  ;;  %v582_v62 = vstv %s1559_s3  ;;  %s860_s3 = sld [smem:[#allocation2 + $0x76]] }
  0x7b   : > { %v575_v24 = vadd.f32 %v574_v43, %v563_v33  ;;  %v585_v58 = vstv %s1561_s4  ;;  %v583_v54 = vmul.f32 %v1545_v59, %v582_v62  ;;  %v588_v9 = vstv %s1569_s5  ;;  %s859_s4 = sld [smem:[#allocation2 + $0x75]]  ;;  %s742_s5 = sshll.u32 %s1694_s12, 3 }
  0x7c   : > { %v578_v5 = vadd.f32 %v577_v17, %v566_v39  ;;  %v586_v63 = vmul.f32 %v1557_v28, %v585_v58  ;;  %v581_v20 = vadd.f32 %v580_v51, %v569_v30  ;;  %v591_v25 = vstv %s1576_s6 }
  0x7d   : > { %v594_v2 = vstv %s1578_s7  ;;  %v548_v21 = vadd.f32 %v547_v42, %v543_v27  ;;  %v584_v29 = vadd.f32 %v583_v54, %v572_v50  ;;  %v589_v3 = vmul.f32 %v1567_v11, %v588_v9 }
  0x7e   : > { %v587_v10 = vadd.f32 %v586_v63, %v575_v24  ;;  %v592_v40 = vmul.f32 %v1574_v7, %v591_v25  ;;  %v600_v36 = vstv %s1584_s8  ;;  %v602_v44 = vstv %s1587_s11  ;;  %s197_s8 = scalar_lea.vmem %s1687_s2, %s742_s5 }
  0x7f   : > { %v604_v53 = vstv %s1589_s14  ;;  %v590_v48 = vadd.f32 %v589_v3, %v578_v5  ;;  %v595_v49 = vadd.f32 %v594_v2, %v584_v29  ;;  %v601_v37 = vmul.f32 %v1445_v32, %v600_v36 }
  0x80   : > { %v603_v45 = vmul.f32 %v1454_v4, %v602_v44  ;;  %v593_v8 = vadd.f32 %v592_v40, %v581_v20  ;;  %v605_v57 = vmul.f32 %v1461_v41, %v604_v53  ;;  %v606_v15 = vstv %s1595_s15 }
  0x81   : > { %v608_v0 = vstv %s1597_s17  ;;  %v596_v13 = vadd.f32 %v595_v49, %v587_v10  ;;  %v607_v19 = vmul.f32 %v1471_v56, %v606_v15  ;;  %v611_v32 = vstv %s1601_s18 }
  0x82   : > { %v609_v1 = vmul.f32 %v1480_v60, %v608_v0  ;;  %v612_v4 = vmul.f32 %v1490_v52, %v611_v32  ;;  %v614_v61 = vstv %s1603_s19  ;;  %v617_v26 = vstv %s1607_s20 }
  0x83   : > { %v620_v31 = vstv %s1609_s21  ;;  %v597_v41 = vadd.f32 %v596_v13, %v590_v48  ;;  %v615_v22 = vmul.f32 %v1497_v12, %v614_v61  ;;  %v618_v6 = vmul.f32 %v1504_v16, %v617_v26 }
  0x84   : > { %v610_v33 = vadd.f32 %v609_v1, %v601_v37  ;;  %v613_v27 = vadd.f32 %v612_v4, %v603_v45  ;;  %v621_v56 = vmul.f32 %v1512_v14, %v620_v31  ;;  %v623_v60 = vstv %s1616_s9 }
  0x85   : > { %v626_v34 = vstv %s1618_s22  ;;  %934 = vtanh.f32 %v548_v21  ;;  %v616_v52 = vadd.f32 %v615_v22, %v605_v57  ;;  %v619_v18 = vadd.f32 %v618_v6, %v607_v19 }
  0x86   : > { %v624_v23 = vmul.f32 %v1522_v38, %v623_v60  ;;  %v622_v39 = vadd.f32 %v621_v56, %v610_v33  ;;  %v627_v30 = vmul.f32 %v1530_v46, %v626_v34  ;;  %v629_v43 = vstv %s1624_s23 }
  0x87   : > { %v632_v12 = vstv %s1626_s24  ;;  %v598_v16 = vadd.f32 %v597_v41, %v593_v8  ;;  %v630_v14 = vmul.f32 %v1535_v55, %v629_v43  ;;  %v635_v17 = vstv %s1632_s25 }
  0x88   : > { %v625_v35 = vadd.f32 %v624_v23, %v613_v27  ;;  %v633_v42 = vmul.f32 %v1545_v59, %v632_v12  ;;  %v628_v50 = vadd.f32 %v627_v30, %v616_v52  ;;  %v638_v47 = vstv %s1636_s26 }
  0x89   : > { %v641_v24 = vstv %s1638_s27  ;;  %v631_v51 = vadd.f32 %v630_v14, %v619_v18  ;;  %v636_v38 = vmul.f32 %v1557_v28, %v635_v17  ;;  %v639_v46 = vmul.f32 %v1567_v11, %v638_v47 }
  0x8a   : > { %v634_v62 = vadd.f32 %v633_v42, %v622_v39  ;;  %v642_v58 = vmul.f32 %v1574_v7, %v641_v24  ;;  %v644_v5 = vstv %s1646_s28  ;;  %936 = vtanh.f32 %v598_v16 }
  0x8b   : > { %v637_v54 = vadd.f32 %v636_v38, %v625_v35  ;;  %v640_v55 = vadd.f32 %v639_v46, %v628_v50  ;;  %v650_v21 = vstv %s857_s29  ;;  %v652_v7 = vstv %s860_s3 }
  0x8c   : > { %v645_v63 = vadd.f32 %v644_v5, %v634_v62  ;;  %v643_v59 = vadd.f32 %v642_v58, %v631_v51  ;;  %v654_v29 = vstv %s858_s30  ;;  %v657_v40 = vstv %s859_s4 }
  0x8e   : > { %v646_v20 = vadd.f32 %v645_v63, %v637_v54 }
  0x8f   : > { %v935_v9 = vpop.eup %934 }
  0x90   : > { %v647_v25 = vadd.f32 %v646_v20, %v640_v55  ;;  %v651_v28 = vmul.f32 %v935_v9, %v650_v21 }
  0x92   : > { %v648_v2 = vadd.f32 %v647_v25, %v643_v59  ;;  %v653_v10 = vadd.f32 %v652_v7, %v651_v28 }
  0x94   : > { %938 = vtanh.f32 %v648_v2  ;;  %v937_v11 = vpop.eup %936 }
  0x95   : > { %v655_v3 = vmul.f32 %v937_v11, %v654_v29 }
  0x97   : > { %v656_v36 = vadd.f32 %v655_v3, %v653_v10 }
  0x9e   : > { %v939_v44 = vpop.eup %938 }
  0x9f   : > { %v658_v53 = vmul.f32 %v939_v44, %v657_v40 }
  0xa1   : > { %v659_v48 = vadd.f32 %v658_v53, %v656_v36 }
  0xa3   : > { %660 = vst [vmem:[%s197_s8] sm:$0xff] %v659_v48 }
  0xa4 PF: > { %p10_p6 = scmp.ge.s32.totalorder %s1018_s13, 7   ;;  %s1690_s9 = smov %s977_s10 }
  0xa5   : > { %s1691_s10 = smov %s1028_s16  ;;  %s1692_s11 = smov %s1018_s13 }
  0xa6   :  { %12 = sbr.rel (!%p10_p6) target bundleno = 2 (0x2), region = 108 }
  0xad   :  { %680 = vsyncpa [#allocation3], 1 }
  0xae   :  { %682 = vsyncpa [#allocation3 + $0x1], 1 }

</bundles_post_ra>
